<compile_context>
chip_gen: v5e
topology: v5e:2x2
jax: 0.10.0
libtpu: 0.0.40
codegen_flags: <defaults>
</compile_context>

<pallas_src>
import functools

import jax
import jax.numpy as jnp
from jax.experimental import pallas as pl
from jax.experimental.pallas import tpu as pltpu


def _round_up(x, m):
    return (x + m - 1) // m * m


def attention_kernel(lens_ref, q_ref, enc_ref, w_in_ref,
                     w_out_q_ref, w_out_c_ref, b_out_ref, out_ref,
                     *, approx_recip):
    bb = pl.program_id(0)
    bt, tq, hp = q_ref.shape
    ts = enc_ref.shape[1]

    # ---- batch-independent matmuls, hoisted over the flattened batch block ----
    qf = q_ref[...].reshape(bt * tq, hp)                   # (bt*tq, hp), MXU dtype
    z = jnp.dot(qf, w_in_ref[...], preferred_element_type=jnp.float32)
    qwq = jnp.dot(qf, w_out_q_ref[...], preferred_element_type=jnp.float32)
    z = z.astype(q_ref.dtype).reshape(bt, tq, hp)          # re-feed the MXU in bf16/f32
    qwq = qwq.reshape(bt, tq, hp)                          # stays f32
    bias = b_out_ref[...]                                  # (1, hp) f32

    col = jax.lax.broadcasted_iota(jnp.int32, (tq, ts), 1)
    neg = jnp.float32(-1e30)                               # finite mask: no inf/NaN

    # Static unroll over the (small) batch block: only the inherently per-batch
    # scores / softmax / context / context-half of linear_out live here.
    for i in range(bt):
        enc_i = enc_ref[i]                                 # (ts, hp)
        # scores = z_i @ enc_i^T expressed without materializing the transpose
        s = jax.lax.dot_general(
            z[i], enc_i,
            dimension_numbers=(((1,), (1,)), ((), ())),
            preferred_element_type=jnp.float32)            # (tq, ts) f32

        length = lens_ref[bb * bt + i]                     # scalar from SMEM
        s = jnp.where(col < length, s, neg)

        # numerically-stable softmax in f32; reciprocal on the EUP slot
        m = jnp.max(s, axis=1, keepdims=True)
        e = jnp.exp(s - m)
        denom = jnp.sum(e, axis=1, keepdims=True)
        align = e * pl.reciprocal(denom, approx=approx_recip)

        ctx = jnp.dot(align.astype(enc_i.dtype), enc_i,
                      preferred_element_type=jnp.float32)  # (tq, hp) f32

        out = qwq[i] + bias + jnp.dot(ctx.astype(w_out_c_ref.dtype),
                                      w_out_c_ref[...],
                                      preferred_element_type=jnp.float32)
        out_ref[i] = jnp.tanh(out)


def attention_pallas(query, encoder_outputs, src_lengths, w_in, w_out, b_out,
                     *, matmul_dtype=jnp.bfloat16):
    """query (B,Tq,H), encoder_outputs (B,Ts,H), src_lengths (B,) int32.

    w_in  : (H, H)    -- nn.Linear(hidden, hidden, bias=False).weight
    w_out : (H, 2H)   -- nn.Linear(2*hidden, hidden).weight
    b_out : (H,)      -- nn.Linear(2*hidden, hidden).bias
    matmul_dtype : dtype fed to the MXU (bf16 on v5e/v6e/v7x); accumulation is f32.
    """
    B, Tq, H = query.shape
    Ts = encoder_outputs.shape[1]
    f32 = jnp.float32

    # ---- TPU-friendly padding -------------------------------------------------
    itemsize = jnp.dtype(matmul_dtype).itemsize
    row_align = 8 * (4 // itemsize)        # 8 for f32, 16 for bf16 (sublane packing)
    Hp = _round_up(H, 128)                 # lane-dense last dim
    Tqp = _round_up(Tq, row_align)
    Tsp = _round_up(Ts, row_align)

    # batch folding: whole batch in one program when small, else blocks of 8
    Bt = B if B <= 8 else 8
    Bp = _round_up(B, Bt)

    q = jnp.pad(jnp.asarray(query, f32),
                ((0, Bp - B), (0, Tqp - Tq), (0, Hp - H)))
    enc = jnp.pad(jnp.asarray(encoder_outputs, f32),
                  ((0, Bp - B), (0, Tsp - Ts), (0, Hp - H)))
    lens = jnp.pad(jnp.asarray(src_lengths, jnp.int32), (0, Bp - B),
                   constant_values=1)

    # pre-transpose to x @ W form; split linear_out weight into q-half / ctx-half
    w_in_t = jnp.pad(jnp.asarray(w_in, f32).T, ((0, Hp - H), (0, Hp - H)))
    w_out_t = jnp.asarray(w_out, f32).T                     # (2H, H)
    w_out_q = jnp.pad(w_out_t[:H], ((0, Hp - H), (0, Hp - H)))
    w_out_c = jnp.pad(w_out_t[H:], ((0, Hp - H), (0, Hp - H)))
    b2 = jnp.pad(jnp.asarray(b_out, f32).reshape(1, H), ((0, 0), (0, Hp - H)))

    # MXU operands in matmul_dtype; elementwise path stays f32
    q_mm = q.astype(matmul_dtype)
    enc_mm = enc.astype(matmul_dtype)
    w_in_mm = w_in_t.astype(matmul_dtype)
    w_out_q_mm = w_out_q.astype(matmul_dtype)
    w_out_c_mm = w_out_c.astype(matmul_dtype)

    kernel = functools.partial(attention_kernel,
                               approx_recip=(matmul_dtype != jnp.float32))

    grid_spec = pltpu.PrefetchScalarGridSpec(
        num_scalar_prefetch=1,                 # src_lengths -> SMEM
        grid=(Bp // Bt,),
        in_specs=[
            pl.BlockSpec((Bt, Tqp, Hp), lambda bb, lens: (bb, 0, 0)),   # query
            pl.BlockSpec((Bt, Tsp, Hp), lambda bb, lens: (bb, 0, 0)),   # encoder
            pl.BlockSpec((Hp, Hp), lambda bb, lens: (0, 0)),            # w_in^T
            pl.BlockSpec((Hp, Hp), lambda bb, lens: (0, 0)),            # w_out_q
            pl.BlockSpec((Hp, Hp), lambda bb, lens: (0, 0)),            # w_out_c
            pl.BlockSpec((1, Hp), lambda bb, lens: (0, 0)),             # bias
        ],
        out_specs=pl.BlockSpec((Bt, Tqp, Hp), lambda bb, lens: (bb, 0, 0)),
    )

    out = pl.pallas_call(
        kernel,
        grid_spec=grid_spec,
        out_shape=jax.ShapeDtypeStruct((Bp, Tqp, Hp), jnp.float32),
        compiler_params=pltpu.CompilerParams(
            dimension_semantics=("parallel",)),   # batch blocks shard across TCs (v7x)
    )(lens, q_mm, enc_mm, w_in_mm, w_out_q_mm, w_out_c_mm, b2)

    return out[:B, :Tq, :H]


def attention_ref(query, encoder_outputs, src_lengths, w_in, w_out, b_out):
    """Pure-JAX reference matching the PyTorch forward exactly."""
    Ts = encoder_outputs.shape[1]
    z = jnp.einsum('btd,hd->bth', query, w_in)                    # linear_in (no bias)
    scores = jnp.einsum('bth,bsh->bts', z, encoder_outputs)       # bmm
    pos = jnp.arange(Ts)[None, :]
    pad_mask = pos >= src_lengths[:, None]                        # True where padded
    scores = jnp.where(pad_mask[:, None, :], -jnp.inf, scores)
    align = jax.nn.softmax(scores, axis=2)
    context = jnp.einsum('bts,bsh->bth', align, encoder_outputs)
    q_c = jnp.concatenate([query, context], axis=2)               # (B, Tq, 2H)
    out = jnp.einsum('btd,hd->bth', q_c, w_out) + b_out
    return jnp.tanh(out)


if __name__ == "__main__":
    B, Tq, Ts, H = 2, 8, 8, 32

    key = jax.random.PRNGKey(0)
    k_q, k_e, k_win, k_wout, k_bout = jax.random.split(key, 5)

    query = jax.random.normal(k_q, (B, Tq, H), dtype=jnp.float32)
    encoder_outputs = jax.random.normal(k_e, (B, Ts, H), dtype=jnp.float32)
    src_lengths = jnp.array([Ts, 5], dtype=jnp.int32)

    w_in = jax.random.normal(k_win, (H, H), dtype=jnp.float32) * 0.1        # linear_in.weight
    w_out = jax.random.normal(k_wout, (H, 2 * H), dtype=jnp.float32) * 0.1  # linear_out.weight
    b_out = jax.random.normal(k_bout, (H,), dtype=jnp.float32) * 0.1        # linear_out.bias

    ref = jax.block_until_ready(
        attention_ref(query, encoder_outputs, src_lengths, w_in, w_out, b_out))

    # Exact-semantics gate: f32 MXU path must match the reference tightly.
    out_f32 = jax.block_until_ready(
        attention_pallas(query, encoder_outputs, src_lengths, w_in, w_out, b_out,
                         matmul_dtype=jnp.float32))
    assert out_f32.shape == (B, Tq, H)
    assert jnp.allclose(out_f32, ref, atol=1e-4, rtol=1e-4), "f32 path mismatch vs reference"

    # Performance path: bf16 MXU operands, f32 accumulate/elementwise (loose sanity check).
    out_bf16 = jax.block_until_ready(
        attention_pallas(query, encoder_outputs, src_lengths, w_in, w_out, b_out,
                         matmul_dtype=jnp.bfloat16))
    assert out_bf16.shape == (B, Tq, H)
    assert bool(jnp.all(jnp.isfinite(out_bf16)))
    assert jnp.allclose(out_bf16, ref, atol=1e-1, rtol=1e-1), "bf16 path mismatch vs reference"

    print("KERNEL_OK")
</pallas_src>

<mosaic_0001>
module attributes {stable_mosaic.version = 11 : i64} {
  func.func @attention_kernel(%arg0: i32, %arg1: memref<2xi32, #tpu.memory_space<smem>>, %arg2: memref<2x8x128xf32, #tpu.memory_space<vmem>>, %arg3: memref<2x8x128xf32, #tpu.memory_space<vmem>>, %arg4: memref<128x128xf32, #tpu.memory_space<vmem>>, %arg5: memref<128x128xf32, #tpu.memory_space<vmem>>, %arg6: memref<128x128xf32, #tpu.memory_space<vmem>>, %arg7: memref<1x128xf32, #tpu.memory_space<vmem>>, %arg8: memref<2x8x128xf32, #tpu.memory_space<vmem>>) attributes {dimension_semantics = [#tpu.dimension_semantics<parallel>], iteration_bounds = array<i64: 1>, scalar_prefetch = 1 : i64, scratch_operands = 0 : i64, tpu.core_type = #tpu.core_type<tc>, window_params = [{transform_indices = @transform_0, window_bounds = array<i64: 2, 8, 128>}, {transform_indices = @transform_1, window_bounds = array<i64: 2, 8, 128>}, {pipeline_mode = #tpu.pipeline_mode<synchronous>, transform_indices = @transform_2, window_bounds = array<i64: 128, 128>}, {pipeline_mode = #tpu.pipeline_mode<synchronous>, transform_indices = @transform_3, window_bounds = array<i64: 128, 128>}, {pipeline_mode = #tpu.pipeline_mode<synchronous>, transform_indices = @transform_4, window_bounds = array<i64: 128, 128>}, {pipeline_mode = #tpu.pipeline_mode<synchronous>, transform_indices = @transform_5, window_bounds = array<i64: 1, 128>}, {transform_indices = @transform_6, window_bounds = array<i64: 2, 8, 128>}]} {
    %c0 = arith.constant 0 : index
    %c0_0 = arith.constant 0 : index
    %c0_1 = arith.constant 0 : index
    %0 = vector.load %arg2[%c0, %c0_0, %c0_1] : memref<2x8x128xf32, #tpu.memory_space<vmem>>, vector<2x8x128xf32>
    %1 = vector.shape_cast %0 : vector<2x8x128xf32> to vector<16x128xf32>
    %c0_2 = arith.constant 0 : index
    %c0_3 = arith.constant 0 : index
    %2 = vector.load %arg4[%c0_2, %c0_3] : memref<128x128xf32, #tpu.memory_space<vmem>>, vector<128x128xf32>
    %cst = arith.constant dense<0.000000e+00> : vector<16x128xf32>
    %3 = tpu.matmul %1, %2, %cst {dimension_numbers = #tpu.dot_dimension_numbers<[1], [0], [0], [1], [0, 0, 1, 1], [], []>} : vector<16x128xf32>, vector<128x128xf32>, vector<16x128xf32> -> vector<16x128xf32>
    %c0_4 = arith.constant 0 : index
    %c0_5 = arith.constant 0 : index
    %4 = vector.load %arg5[%c0_4, %c0_5] : memref<128x128xf32, #tpu.memory_space<vmem>>, vector<128x128xf32>
    %cst_6 = arith.constant dense<0.000000e+00> : vector<16x128xf32>
    %5 = tpu.matmul %1, %4, %cst_6 {dimension_numbers = #tpu.dot_dimension_numbers<[1], [0], [0], [1], [0, 0, 1, 1], [], []>} : vector<16x128xf32>, vector<128x128xf32>, vector<16x128xf32> -> vector<16x128xf32>
    %6 = vector.shape_cast %3 : vector<16x128xf32> to vector<2x8x128xf32>
    %7 = vector.shape_cast %5 : vector<16x128xf32> to vector<2x8x128xf32>
    %c0_7 = arith.constant 0 : index
    %c0_8 = arith.constant 0 : index
    %8 = vector.load %arg7[%c0_7, %c0_8] : memref<1x128xf32, #tpu.memory_space<vmem>>, vector<1x128xf32>
    %9 = tpu.iota {dimensions = array<i32: 1>} : vector<8x8xi32>
    %c0_9 = arith.constant 0 : index
    %c0_10 = arith.constant 0 : index
    %c0_11 = arith.constant 0 : index
    %10 = vector.load %arg3[%c0_9, %c0_10, %c0_11] : memref<2x8x128xf32, #tpu.memory_space<vmem>>, vector<1x8x128xf32>
    %11 = vector.shape_cast %10 : vector<1x8x128xf32> to vector<8x128xf32>
    %12 = vector.extract_strided_slice %6 {offsets = [0, 0, 0], sizes = [1, 8, 128], strides = [1, 1, 1]} : vector<2x8x128xf32> to vector<1x8x128xf32>
    %13 = vector.shape_cast %12 : vector<1x8x128xf32> to vector<8x128xf32>
    %cst_12 = arith.constant dense<0.000000e+00> : vector<8x8xf32>
    %14 = tpu.matmul %13, %11, %cst_12 {dimension_numbers = #tpu.dot_dimension_numbers<[1], [1], [0], [0], [0, 0, 1, 0], [], []>} : vector<8x128xf32>, vector<8x128xf32>, vector<8x8xf32> -> vector<8x8xf32>
    %c2_i32 = arith.constant 2 : i32
    %15 = arith.muli %arg0, %c2_i32 : i32
    %c0_i32 = arith.constant 0 : i32
    %16 = arith.addi %15, %c0_i32 : i32
    %17 = arith.index_cast %16 : i32 to index
    %18 = memref.load %arg1[%17] : memref<2xi32, #tpu.memory_space<smem>>
    %19 = vector.broadcast %18 : i32 to vector<8x8xi32>
    %20 = arith.cmpi slt, %9, %19 : vector<8x8xi32>
    %cst_13 = arith.constant -1.000000e+30 : f32
    %21 = vector.broadcast %cst_13 : f32 to vector<8x8xf32>
    %22 = arith.select %20, %14, %21 : vector<8x8xi1>, vector<8x8xf32>
    %cst_14 = arith.constant dense<0xFF800000> : vector<8xf32>
    %23 = vector.multi_reduction <maximumf>, %22, %cst_14 [1] : vector<8x8xf32> to vector<8xf32>
    %24 = vector.shape_cast %23 : vector<8xf32> to vector<8x1xf32>
    %25 = vector.broadcast %24 : vector<8x1xf32> to vector<8x8xf32>
    %26 = arith.subf %22, %25 : vector<8x8xf32>
    %27 = math.exp %26 : vector<8x8xf32>
    %cst_15 = arith.constant dense<0.000000e+00> : vector<8xf32>
    %28 = vector.multi_reduction <add>, %27, %cst_15 [1] : vector<8x8xf32> to vector<8xf32>
    %29 = vector.shape_cast %28 : vector<8xf32> to vector<8x1xf32>
    %30 = tpu.reciprocal %29 : vector<8x1xf32> -> vector<8x1xf32>
    %31 = vector.broadcast %30 : vector<8x1xf32> to vector<8x8xf32>
    %32 = arith.mulf %27, %31 : vector<8x8xf32>
    %cst_16 = arith.constant dense<0.000000e+00> : vector<8x128xf32>
    %33 = tpu.matmul %32, %11, %cst_16 {dimension_numbers = #tpu.dot_dimension_numbers<[1], [0], [0], [1], [0, 0, 1, 1], [], []>} : vector<8x8xf32>, vector<8x128xf32>, vector<8x128xf32> -> vector<8x128xf32>
    %34 = vector.extract_strided_slice %7 {offsets = [0, 0, 0], sizes = [1, 8, 128], strides = [1, 1, 1]} : vector<2x8x128xf32> to vector<1x8x128xf32>
    %35 = vector.shape_cast %34 : vector<1x8x128xf32> to vector<8x128xf32>
    %36 = vector.broadcast %8 : vector<1x128xf32> to vector<8x128xf32>
    %37 = arith.addf %35, %36 : vector<8x128xf32>
    %c0_17 = arith.constant 0 : index
    %c0_18 = arith.constant 0 : index
    %38 = vector.load %arg6[%c0_17, %c0_18] : memref<128x128xf32, #tpu.memory_space<vmem>>, vector<128x128xf32>
    %cst_19 = arith.constant dense<0.000000e+00> : vector<8x128xf32>
    %39 = tpu.matmul %33, %38, %cst_19 {dimension_numbers = #tpu.dot_dimension_numbers<[1], [0], [0], [1], [0, 0, 1, 1], [], []>} : vector<8x128xf32>, vector<128x128xf32>, vector<8x128xf32> -> vector<8x128xf32>
    %40 = arith.addf %37, %39 : vector<8x128xf32>
    %41 = math.tanh %40 : vector<8x128xf32>
    %c0_20 = arith.constant 0 : index
    %c0_21 = arith.constant 0 : index
    %c0_22 = arith.constant 0 : index
    %42 = vector.load %arg8[%c0_20, %c0_21, %c0_22] : memref<2x8x128xf32, #tpu.memory_space<vmem>>, vector<1x8x128xf32>
    %43 = vector.shape_cast %42 : vector<1x8x128xf32> to vector<8x128xf32>
    %44 = vector.shape_cast %41 : vector<8x128xf32> to vector<1x8x128xf32>
    tpu.vector_store %arg8[%c0_20, %c0_21, %c0_22], %44 {strides = array<i32>} : memref<2x8x128xf32, #tpu.memory_space<vmem>>, vector<1x8x128xf32>,
    %c1 = arith.constant 1 : index
    %c0_23 = arith.constant 0 : index
    %c0_24 = arith.constant 0 : index
    %45 = vector.load %arg3[%c1, %c0_23, %c0_24] : memref<2x8x128xf32, #tpu.memory_space<vmem>>, vector<1x8x128xf32>
    %46 = vector.shape_cast %45 : vector<1x8x128xf32> to vector<8x128xf32>
    %47 = vector.extract_strided_slice %6 {offsets = [1, 0, 0], sizes = [1, 8, 128], strides = [1, 1, 1]} : vector<2x8x128xf32> to vector<1x8x128xf32>
    %48 = vector.shape_cast %47 : vector<1x8x128xf32> to vector<8x128xf32>
    %cst_25 = arith.constant dense<0.000000e+00> : vector<8x8xf32>
    %49 = tpu.matmul %48, %46, %cst_25 {dimension_numbers = #tpu.dot_dimension_numbers<[1], [1], [0], [0], [0, 0, 1, 0], [], []>} : vector<8x128xf32>, vector<8x128xf32>, vector<8x8xf32> -> vector<8x8xf32>
    %c2_i32_26 = arith.constant 2 : i32
    %50 = arith.muli %arg0, %c2_i32_26 : i32
    %c1_i32 = arith.constant 1 : i32
    %51 = arith.addi %50, %c1_i32 : i32
    %52 = arith.index_cast %51 : i32 to index
    %53 = memref.load %arg1[%52] : memref<2xi32, #tpu.memory_space<smem>>
    %54 = vector.broadcast %53 : i32 to vector<8x8xi32>
    %55 = arith.cmpi slt, %9, %54 : vector<8x8xi32>
    %cst_27 = arith.constant -1.000000e+30 : f32
    %56 = vector.broadcast %cst_27 : f32 to vector<8x8xf32>
    %57 = arith.select %55, %49, %56 : vector<8x8xi1>, vector<8x8xf32>
    %cst_28 = arith.constant dense<0xFF800000> : vector<8xf32>
    %58 = vector.multi_reduction <maximumf>, %57, %cst_28 [1] : vector<8x8xf32> to vector<8xf32>
    %59 = vector.shape_cast %58 : vector<8xf32> to vector<8x1xf32>
    %60 = vector.broadcast %59 : vector<8x1xf32> to vector<8x8xf32>
    %61 = arith.subf %57, %60 : vector<8x8xf32>
    %62 = math.exp %61 : vector<8x8xf32>
    %cst_29 = arith.constant dense<0.000000e+00> : vector<8xf32>
    %63 = vector.multi_reduction <add>, %62, %cst_29 [1] : vector<8x8xf32> to vector<8xf32>
    %64 = vector.shape_cast %63 : vector<8xf32> to vector<8x1xf32>
    %65 = tpu.reciprocal %64 : vector<8x1xf32> -> vector<8x1xf32>
    %66 = vector.broadcast %65 : vector<8x1xf32> to vector<8x8xf32>
    %67 = arith.mulf %62, %66 : vector<8x8xf32>
    %cst_30 = arith.constant dense<0.000000e+00> : vector<8x128xf32>
    %68 = tpu.matmul %67, %46, %cst_30 {dimension_numbers = #tpu.dot_dimension_numbers<[1], [0], [0], [1], [0, 0, 1, 1], [], []>} : vector<8x8xf32>, vector<8x128xf32>, vector<8x128xf32> -> vector<8x128xf32>
    %69 = vector.extract_strided_slice %7 {offsets = [1, 0, 0], sizes = [1, 8, 128], strides = [1, 1, 1]} : vector<2x8x128xf32> to vector<1x8x128xf32>
    %70 = vector.shape_cast %69 : vector<1x8x128xf32> to vector<8x128xf32>
    %71 = vector.broadcast %8 : vector<1x128xf32> to vector<8x128xf32>
    %72 = arith.addf %70, %71 : vector<8x128xf32>
    %c0_31 = arith.constant 0 : index
    %c0_32 = arith.constant 0 : index
    %73 = vector.load %arg6[%c0_31, %c0_32] : memref<128x128xf32, #tpu.memory_space<vmem>>, vector<128x128xf32>
    %cst_33 = arith.constant dense<0.000000e+00> : vector<8x128xf32>
    %74 = tpu.matmul %68, %73, %cst_33 {dimension_numbers = #tpu.dot_dimension_numbers<[1], [0], [0], [1], [0, 0, 1, 1], [], []>} : vector<8x128xf32>, vector<128x128xf32>, vector<8x128xf32> -> vector<8x128xf32>
    %75 = arith.addf %72, %74 : vector<8x128xf32>
    %76 = math.tanh %75 : vector<8x128xf32>
    %c1_34 = arith.constant 1 : index
    %c0_35 = arith.constant 0 : index
    %c0_36 = arith.constant 0 : index
    %77 = vector.load %arg8[%c1_34, %c0_35, %c0_36] : memref<2x8x128xf32, #tpu.memory_space<vmem>>, vector<1x8x128xf32>
    %78 = vector.shape_cast %77 : vector<1x8x128xf32> to vector<8x128xf32>
    %79 = vector.shape_cast %76 : vector<8x128xf32> to vector<1x8x128xf32>
    tpu.vector_store %arg8[%c1_34, %c0_35, %c0_36], %79 {strides = array<i32>} : memref<2x8x128xf32, #tpu.memory_space<vmem>>, vector<1x8x128xf32>,
    return
  }
  func.func @transform_0(%arg0: i32, %arg1: memref<2xi32, #tpu.memory_space<smem>>) -> (i32, i32, i32) {
    %c0_i32 = arith.constant 0 : i32
    %c0_i32_0 = arith.constant 0 : i32
    %c0_i32_1 = arith.constant 0 : i32
    return %arg0, %c0_i32, %c0_i32_0 : i32, i32, i32
  }
  func.func @transform_1(%arg0: i32, %arg1: memref<2xi32, #tpu.memory_space<smem>>) -> (i32, i32, i32) {
    %c0_i32 = arith.constant 0 : i32
    %c0_i32_0 = arith.constant 0 : i32
    %c0_i32_1 = arith.constant 0 : i32
    return %arg0, %c0_i32, %c0_i32_0 : i32, i32, i32
  }
  func.func @transform_2(%arg0: i32, %arg1: memref<2xi32, #tpu.memory_space<smem>>) -> (i32, i32) {
    %c0_i32 = arith.constant 0 : i32
    %c0_i32_0 = arith.constant 0 : i32
    %c0_i32_1 = arith.constant 0 : i32
    return %c0_i32, %c0_i32_0 : i32, i32
  }
  func.func @transform_3(%arg0: i32, %arg1: memref<2xi32, #tpu.memory_space<smem>>) -> (i32, i32) {
    %c0_i32 = arith.constant 0 : i32
    %c0_i32_0 = arith.constant 0 : i32
    %c0_i32_1 = arith.constant 0 : i32
    return %c0_i32, %c0_i32_0 : i32, i32
  }
  func.func @transform_4(%arg0: i32, %arg1: memref<2xi32, #tpu.memory_space<smem>>) -> (i32, i32) {
    %c0_i32 = arith.constant 0 : i32
    %c0_i32_0 = arith.constant 0 : i32
    %c0_i32_1 = arith.constant 0 : i32
    return %c0_i32, %c0_i32_0 : i32, i32
  }
  func.func @transform_5(%arg0: i32, %arg1: memref<2xi32, #tpu.memory_space<smem>>) -> (i32, i32) {
    %c0_i32 = arith.constant 0 : i32
    %c0_i32_0 = arith.constant 0 : i32
    %c0_i32_1 = arith.constant 0 : i32
    return %c0_i32, %c0_i32_0 : i32, i32
  }
  func.func @transform_6(%arg0: i32, %arg1: memref<2xi32, #tpu.memory_space<smem>>) -> (i32, i32, i32) {
    %c0_i32 = arith.constant 0 : i32
    %c0_i32_0 = arith.constant 0 : i32
    %c0_i32_1 = arith.constant 0 : i32
    return %arg0, %c0_i32, %c0_i32_0 : i32, i32, i32
  }
}

</mosaic_0001>

<bundles_post_ra>
// kernel: tpu_custom_call.1
= control target key start
LH: loop header
LB: loop body
LE: loop exit
PB: predicated region body
PF: predicated region fallthrough
CT: control target
= control target key end

     0   :  { %s638_s27 = smov [#allocation3]   ;;  %s758_s0 = inlined_call_operand.hbm [shape: s32[2], index: 0, kind: input, shape index: {}]   ;;  %s759_s1 = inlined_call_operand.hbm [shape: f32[2,8,128], index: 1, kind: input, shape index: {}]   ;;  %s760_s2 = inlined_call_operand.hbm [shape: f32[2,8,128], index: 2, kind: input, shape index: {}]   ;;  %s761_s3 = inlined_call_operand.hbm [shape: f32[128,128], index: 3, kind: input, shape index: {}]   ;;  %s762_s4 = inlined_call_operand.hbm [shape: f32[128,128], index: 4, kind: input, shape index: {}]   ;;  %s763_s5 = inlined_call_operand.hbm [shape: f32[128,128], index: 5, kind: input, shape index: {}]   ;;  %s764_s6 = inlined_call_operand.vmem [shape: f32[1,128], index: 6, kind: input, shape index: {}]   ;;  %s765_s7 = inlined_call_operand.hbm [shape: f32[2,8,128], index: 7, kind: output, shape index: {}]  }
   0x1   :  { %s13_s26 = sshll.u32 %s758_s0, 4  ;;  %s14_s26 = int_to_ptr.hbm [resolvable:$true] %s13_s26 }
   0x2   :  { %16 = dma.hbm_to_smem %s14_s26, 16, %s638_s27, [#allocation2] }
   0x3   :  { %628 = dma.done.wait [#allocation2], 16 }
   0x4   :  { %629 = vsyncadd [#allocation2], 4294967280 }
   0x5   :  { %19 = sfence }
   0x6   :  { %20 = vsyncpa [#allocation5], 0 }
   0x7   :  { %21 = vsyncpa [#allocation8], 0 }
   0x8   :  { %22 = vsyncpa [#allocation11], 0 }
   0x9   :  { %23 = vsyncpa [#allocation6], 0  ;;  %s41_s30 = sshll.u32 %s760_s2, 4  ;;  %s639_s8 = smov [#allocation7]   ;;  %s42_s30 = int_to_ptr.hbm [resolvable:$true] %s41_s30 }
   0xa   :  { %s43_s9 = sshll.u32 %s639_s8, 4  ;;  %s67_s11 = sshll.u32 %s762_s4, 4  ;;  %s44_s9 = int_to_ptr.vmem [resolvable:$true] %s43_s9  ;;  %s68_s11 = int_to_ptr.hbm [resolvable:$true] %s67_s11 }
   0xb   :  { %s640_s12 = smov 128   ;;  %s641_s13 = smov 8  }
   0xc   :  { %49 = dma.hbm_to_vmem [thread:$0]  %s42_s30, 256, %s44_s9, [#allocation8], %s640_s12, %s640_s12, %s641_s13  }
   0xd   :  { %s642_s14 = smov [#allocation10]   ;;  %s28_s2 = sshll.u32 %s759_s1, 4  ;;  %s29_s2 = int_to_ptr.hbm [resolvable:$true] %s28_s2 }
   0xe   :  { %s69_s15 = sshll.u32 %s642_s14, 4  ;;  %s54_s19 = sshll.u32 %s761_s3, 4  ;;  %s70_s15 = int_to_ptr.vmem [resolvable:$true] %s69_s15  ;;  %s55_s19 = int_to_ptr.hbm [resolvable:$true] %s54_s19 }
   0xf   :  { %75 = dma.hbm_to_vmem [thread:$0]  %s68_s11, 2048, %s70_s15, [#allocation11], %s640_s12, %s640_s12, %s641_s13  }
  0x10   :  { %s643_s20 = smov [#allocation4]   ;;  %s644_s22 = smov [#allocation9]  }
  0x11   :  { %s30_s21 = sshll.u32 %s643_s20, 4  ;;  %s56_s1 = sshll.u32 %s644_s22, 4  ;;  %s31_s21 = int_to_ptr.vmem [resolvable:$true] %s30_s21  ;;  %s57_s1 = int_to_ptr.vmem [resolvable:$true] %s56_s1 }
  0x12   :  { %36 = dma.hbm_to_vmem [thread:$0]  %s29_s2, 256, %s31_s21, [#allocation5], %s640_s12, %s640_s12, %s641_s13  }
  0x13   :  { %s80_s25 = sshll.u32 %s763_s5, 4  ;;  %s645_s3 = smov [#allocation12]   ;;  %s81_s25 = int_to_ptr.hbm [resolvable:$true] %s80_s25 }
  0x14   :  { %62 = dma.hbm_to_vmem [thread:$0]  %s55_s19, 2048, %s57_s1, [#allocation8], %s640_s12, %s640_s12, %s641_s13  }
  0x15   :  { %s82_s26 = sshll.u32 %s645_s3, 4  ;;  %s83_s26 = int_to_ptr.vmem [resolvable:$true] %s82_s26 }
  0x16   :  { %88 = dma.hbm_to_vmem [thread:$0]  %s81_s25, 2048, %s83_s26, [#allocation11], %s640_s12, %s640_s12, %s641_s13  }
  0x17   :  { %630 = dma.done.wait [#allocation5], 256  }
  0x18   :  { %631 = vsyncadd [#allocation5], 4294967040 }
  0x19   :  { %632 = dma.done.wait [#allocation8], 2304  }
  0x1a   :  { %633 = vsyncadd [#allocation8], 4294964992 }
  0x1b   :  { %634 = dma.done.wait [#allocation11], 4096  }
  0x1c   :  { %635 = vsyncadd [#allocation11], 4294963200  ;;  %v128_v0 = vld [vmem:[#allocation9 + $0x78] sm:$0xff]  ;;  %v127_v1 = vld [vmem:[#allocation9 + $0x70] sm:$0xff]  ;;  %s216_s5 = sld [smem:[#allocation3]]  ;;  %v192_v22 = vlaneseq  ;;  %vm220_vm1 = vcmask 64512  }
  0x1d   :  { %129 = vmatpush.msra.mxu0 %v128_v0  ;;  %v126_v2 = vld [vmem:[#allocation9 + $0x68] sm:$0xff]  ;;  %v125_v3 = vld [vmem:[#allocation9 + $0x60] sm:$0xff]  ;;  %v124_v4 = vld [vmem:[#allocation9 + $0x58] sm:$0xff]  ;;  %s448_s27 = sld [smem:[#allocation3 + $0x1]]  ;;  %s646_s30 = smov [#allocation13]  }
  0x1e   :  { %v123_v5 = vld [vmem:[#allocation9 + $0x50] sm:$0xff]  ;;  %v122_v7 = vld [vmem:[#allocation9 + $0x48] sm:$0xff]  ;;  %v121_v8 = vld [vmem:[#allocation9 + $0x40] sm:$0xff]  ;;  %v193_v23 = vand.u32 127, %v192_v22  ;;  %s430_s8 = sshll.u32 %s646_s30, 4  ;;  %s432_s0 = sshll.u32 %s765_s7, 4  ;;  %s431_s8 = int_to_ptr.vmem [resolvable:$true] %s430_s8  ;;  %s433_s0 = int_to_ptr.hbm [resolvable:$true] %s432_s0 }
  0x1f   :  { %130 = vmatpush.msra.mxu0 %v127_v1  ;;  %v194_v6 = vld [vmem:[#allocation7] sm:$0xff]  ;;  %v120_v9 = vld [vmem:[#allocation9 + $0x38] sm:$0xff]  ;;  %v118_v11 = vld [vmem:[#allocation9 + $0x28] sm:$0xff] }
  0x20   :  { %210 = vmatpush.xpose.msra.mxu3 %v194_v6  ;;  %v119_v10 = vld [vmem:[#allocation9 + $0x30] sm:$0xff]  ;;  %v117_v12 = vld [vmem:[#allocation9 + $0x20] sm:$0xff]  ;;  %v116_v13 = vld [vmem:[#allocation9 + $0x18] sm:$0xff] }
  0x21   :  { %131 = vmatpush.msra.mxu0 %v126_v2  ;;  %v115_v14 = vld [vmem:[#allocation9 + $0x10] sm:$0xff]  ;;  %v114_v15 = vld [vmem:[#allocation9 + $0x8] sm:$0xff]  ;;  %v113_v16 = vld [vmem:[#allocation9] sm:$0xff] }
  0x22   :  { %v720_v17 = vld [vmem:[#allocation4] sm:$0xff]  ;;  %v723_v18 = vld [vmem:[#allocation4 + $0x8] sm:$0xff]  ;;  %v312_v19 = vld [vmem:[#allocation7 + $0x8] sm:$0xff]  ;;  %v217_v24 = vstv %s216_s5 }
  0x23   :  { %132 = vmatpush.msra.mxu0 %v125_v3  ;;  %328 = vmatpush.xpose.msra.mxu2 %v312_v19  ;;  %vm218_vm0 = vcmp.lt.s32.totalorder %v193_v23, %v217_v24  ;;  %v335_v28 = vstv %s448_s27  ;;  %v287_v42 = vld [vmem:[#allocation12 + $0x78] sm:$0xff]  ;;  %v286_v43 = vld [vmem:[#allocation12 + $0x70] sm:$0xff]  ;;  %v285_v46 = vld [vmem:[#allocation12 + $0x68] sm:$0xff] }
  0x24   :  { %263 = vmatpush.msrb.mxu3 %v194_v6  ;;  %vm336_vm2 = vcmp.lt.s32.totalorder %v193_v23, %v335_v28  ;;  %v167_v44 = vld [vmem:[#allocation10 + $0x78] sm:$0xff]  ;;  %v166_v45 = vld [vmem:[#allocation10 + $0x70] sm:$0xff]  ;;  %v165_v47 = vld [vmem:[#allocation10 + $0x68] sm:$0xff] }
  0x25   :  { %133 = vmatpush.msra.mxu0 %v124_v4  ;;  %168 = vmatpush.msra.mxu1 %v167_v44  ;;  %v284_v49 = vld [vmem:[#allocation12 + $0x60] sm:$0xff]  ;;  %v283_v51 = vld [vmem:[#allocation12 + $0x58] sm:$0xff]  ;;  %v282_v53 = vld [vmem:[#allocation12 + $0x50] sm:$0xff] }
  0x26   :  { %v164_v50 = vld [vmem:[#allocation10 + $0x60] sm:$0xff]  ;;  %v163_v52 = vld [vmem:[#allocation10 + $0x58] sm:$0xff]  ;;  %v162_v54 = vld [vmem:[#allocation10 + $0x50] sm:$0xff] }
  0x27   :  { %134 = vmatpush.msra.mxu0 %v123_v5  ;;  %380 = vmatpush.msrb.mxu2 %v312_v19  ;;  %v281_v55 = vld [vmem:[#allocation12 + $0x48] sm:$0xff]  ;;  %v280_v60 = vld [vmem:[#allocation12 + $0x40] sm:$0xff]  ;;  %v279_v63 = vld [vmem:[#allocation12 + $0x38] sm:$0xff] }
  0x28   :  { %169 = vmatpush.msra.mxu1 %v166_v45  ;;  %v161_v56 = vld [vmem:[#allocation10 + $0x48] sm:$0xff]  ;;  %v160_v61 = vld [vmem:[#allocation10 + $0x40] sm:$0xff]  ;;  %v159_v0 = vld [vmem:[#allocation10 + $0x38] sm:$0xff] }
  0x29   :  { %135 = vmatpush.msra.mxu0 %v122_v7  ;;  %v278_v4 = vld [vmem:[#allocation12 + $0x30] sm:$0xff]  ;;  %v277_v7 = vld [vmem:[#allocation12 + $0x28] sm:$0xff] }
  0x2a   :  { %170 = vmatpush.msra.mxu1 %v165_v47  ;;  %v158_v5 = vld [vmem:[#allocation10 + $0x30] sm:$0xff]  ;;  %v273_v28 = vld [vmem:[#allocation12 + $0x8] sm:$0xff] }
  0x2b   :  { %136 = vmatpush.msra.mxu0 %v121_v8  ;;  %v157_v8 = vld [vmem:[#allocation10 + $0x28] sm:$0xff] }
  0x2c   :  { %171 = vmatpush.msra.mxu1 %v164_v50 }
  0x2d   :  { %137 = vmatpush.msra.mxu0 %v120_v9 }
  0x2e   :  { %172 = vmatpush.msra.mxu1 %v163_v52 }
  0x2f   :  { %138 = vmatpush.msra.mxu0 %v119_v10 }
  0x30   :  { %173 = vmatpush.msra.mxu1 %v162_v54 }
  0x31   :  { %139 = vmatpush.msra.mxu0 %v118_v11 }
  0x32   :  { %174 = vmatpush.msra.mxu1 %v161_v56 }
  0x33   :  { %140 = vmatpush.msra.mxu0 %v117_v12 }
  0x34   :  { %175 = vmatpush.msra.mxu1 %v160_v61 }
  0x35   :  { %141 = vmatpush.msra.mxu0 %v116_v13  ;;  %v276_v13 = vld [vmem:[#allocation12 + $0x20] sm:$0xff] }
  0x36   :  { %176 = vmatpush.msra.mxu1 %v159_v0 }
  0x37   :  { %142 = vmatpush.msra.mxu0 %v115_v14  ;;  %v156_v14 = vld [vmem:[#allocation10 + $0x20] sm:$0xff] }
  0x38   :  { %177 = vmatpush.msra.mxu1 %v158_v5 }
  0x39   :  { %143 = vmatpush.msra.mxu0 %v114_v15 }
  0x3a   :  { %178 = vmatpush.msra.mxu1 %v157_v8 }
  0x3b   :  { %144 = vmatpush.msra.mxu0 %v113_v16 }
  0x3c   :  { %145 = vmatmul.f32.vlgmr.msra.gmra.mxu0 %v720_v17  ;;  %179 = vmatpush.msra.mxu1 %v156_v14 }
  0x44   :  { %148 = vmatmul.f32.gmra.mxu0 %v723_v18 }
  0xb9   :  { %v146_v20 = vpop.f32.mrf.mxu0 }
  0xba   :  { %211 = vmatmul.f32.vlgmr.msra.gmra.mxu3 %v146_v20  ;;  %v275_v20 = vld [vmem:[#allocation12 + $0x18] sm:$0xff] }
  0xbb   :  { %288 = vmatpush.msra.mxu3 %v287_v42 }
  0xbd   :  { %289 = vmatpush.msra.mxu3 %v286_v43 }
  0xbf   :  { %290 = vmatpush.msra.mxu3 %v285_v46 }
  0xc1   :  { %v149_v21 = vpop.f32.mrf.mxu0  ;;  %291 = vmatpush.msra.mxu3 %v284_v49 }
  0xc2   :  { %329 = vmatmul.f32.vlgmr.msra.gmra.mxu2 %v149_v21  ;;  %v155_v21 = vld [vmem:[#allocation10 + $0x18] sm:$0xff] }
  0xc3   :  { %402 = vmatpush.msra.mxu2 %v287_v42  ;;  %292 = vmatpush.msra.mxu3 %v283_v51 }
  0xc4   :  { %180 = vmatpush.msra.mxu1 %v155_v21 }
  0xc5   :  { %403 = vmatpush.msra.mxu2 %v286_v43  ;;  %293 = vmatpush.msra.mxu3 %v282_v53 }
  0xc7   :  { %404 = vmatpush.msra.mxu2 %v285_v46  ;;  %294 = vmatpush.msra.mxu3 %v281_v55 }
  0xc9   :  { %405 = vmatpush.msra.mxu2 %v284_v49  ;;  %295 = vmatpush.msra.mxu3 %v280_v60 }
  0xcb   :  { %406 = vmatpush.msra.mxu2 %v283_v51  ;;  %296 = vmatpush.msra.mxu3 %v279_v63 }
  0xcd   :  { %407 = vmatpush.msra.mxu2 %v282_v53  ;;  %297 = vmatpush.msra.mxu3 %v278_v4 }
  0xcf   :  { %408 = vmatpush.msra.mxu2 %v281_v55  ;;  %298 = vmatpush.msra.mxu3 %v277_v7 }
  0xd1   :  { %409 = vmatpush.msra.mxu2 %v280_v60  ;;  %299 = vmatpush.msra.mxu3 %v276_v13 }
  0xd3   :  { %410 = vmatpush.msra.mxu2 %v279_v63  ;;  %300 = vmatpush.msra.mxu3 %v275_v20 }
  0xd5   :  { %411 = vmatpush.msra.mxu2 %v278_v4 }
  0xd7   :  { %412 = vmatpush.msra.mxu2 %v277_v7 }
  0xd9   :  { %413 = vmatpush.msra.mxu2 %v276_v13 }
  0xdb   :  { %414 = vmatpush.msra.mxu2 %v275_v20 }
 0x13d   :  { %v212_v25 = vpop.f32.mrf.mxu3 }
 0x13e   :  { %v219_v26 = vsel %vm218_vm0, %v212_v25, -1e+30  ;;  %v274_v25 = vld [vmem:[#allocation12 + $0x10] sm:$0xff] }
 0x13f   :  { %v221_v27 = vsel %vm220_vm1, %v219_v26, -inf  ;;  %301 = vmatpush.msra.mxu3 %v274_v25  ;;  %415 = vmatpush.msra.mxu2 %v274_v25 }
 0x140   :  { %222 = vmax.xlane.f32.xlu0 %v221_v27 }
 0x141   :  { %302 = vmatpush.msra.mxu3 %v273_v28  ;;  %416 = vmatpush.msra.mxu2 %v273_v28 }
 0x145   :  { %v330_v29 = vpop.f32.mrf.mxu2 }
 0x146   :  { %v337_v30 = vsel %vm336_vm2, %v330_v29, -1e+30 }
 0x147   :  { %v338_v31 = vsel %vm220_vm1, %v337_v30, -inf }
 0x148   :  { %339 = vmax.xlane.f32.xlu0 %v338_v31 }
 0x1b3   :  { %v223_v32 = vpop.xlane.xlu0 %222 }
 0x1b4   :  { %v224_v33 = vsub.f32 %v219_v26, %v223_v32  ;;  %v154_v26 = vld [vmem:[#allocation10 + $0x10] sm:$0xff] }
 0x1b5   :  { %181 = vmatpush.msra.mxu1 %v154_v26 }
 0x1b6   :  { %v225_v34 = vmul.f32 1.442695, %v224_v33  ;;  %v272_v33 = vld [vmem:[#allocation12] sm:$0xff] }
 0x1b7   :  { %303 = vmatpush.msra.mxu3 %v272_v33  ;;  %417 = vmatpush.msra.mxu2 %v272_v33 }
 0x1b8   :  { %460 = vpow2.f32 %v225_v34  ;;  %v153_v34 = vld [vmem:[#allocation10 + $0x8] sm:$0xff] }
 0x1b9   :  { %182 = vmatpush.msra.mxu1 %v153_v34 }
 0x1bb   :  { %v340_v35 = vpop.xlane.xlu0 %339 }
 0x1bc   :  { %v341_v36 = vsub.f32 %v337_v30, %v340_v35  ;;  %v152_v35 = vld [vmem:[#allocation10] sm:$0xff] }
 0x1bd   :  { %183 = vmatpush.msra.mxu1 %v152_v35 }
 0x1be   :  { %v728_v37 = vpop.eup %460  ;;  %v342_v38 = vmul.f32 1.442695, %v341_v36  ;;  %184 = vmatmul.f32.vlgmr.msra.gmra.mxu1 %v720_v17 }
 0x1bf   :  { %v227_v39 = vsel %vm220_vm1, %v728_v37, 0.0 }
 0x1c0   :  { %462 = vpow2.f32 %v342_v38  ;;  %228 = vadd.xlane.f32.xlu1 %v227_v39  ;;  %v459_v39 = vld [vmem:[%s764_s6] ss:$0 sm:$0xff] }
 0x1c6   :  { %v732_v40 = vpop.eup %462  ;;  %187 = vmatmul.f32.gmra.mxu1 %v723_v18 }
 0x1c7   :  { %v344_v41 = vsel %vm220_vm1, %v732_v40, 0.0 }
 0x1c8   :  { %345 = vadd.xlane.f32.xlu1 %v344_v41 }
 0x233   :  { %v229_v48 = vpop.xlane.xlu1 %228 }
 0x234   :  { %464 = vrcp.f32 %v229_v48  ;;  %v241_v1 = vand.u32 2147483648, %v229_v48  ;;  %v239_v3 = vand.u32 2147483647, %v229_v48  ;;  %vm235_vm4 = vweird.f32 %v229_v48 }
 0x236   :  { %v242_v10 = vor.u32 1.1754944e-38, %v241_v1  ;;  %vm240_vm6 = vcmp.eq.f32.partialorder %v239_v3, 8.507059e+37 }
 0x23a   :  { %v465_v57 = vpop.eup %464 }
 0x23b   :  { %v231_v58 = vmul.f32 %v465_v57, %v229_v48  ;;  %v736_v59 = vpop.xlane.xlu1 %345  ;;  %vm236_vm3 = vweird.f32 %v465_v57  ;;  %v185_v38 = vpop.f32.mrf.mxu1 }
 0x23c   :  { %466 = vrcp.f32 %v736_v59  ;;  %vm237_vm5 = vmor %vm235_vm4, %vm236_vm3  ;;  %v358_v22 = vand.u32 2147483648, %v736_v59  ;;  %v356_v24 = vand.u32 2147483647, %v736_v59  ;;  %vm352_vm8 = vweird.f32 %v736_v59 }
 0x23d   :  { %v232_v62 = vsub.f32 1.0, %v231_v58 }
 0x23e   :  { %v359_v29 = vor.u32 1.1754944e-38, %v358_v22  ;;  %vm357_vm10 = vcmp.eq.f32.partialorder %v356_v24, 8.507059e+37 }
 0x23f   :  { %v233_v2 = vmul.f32 %v465_v57, %v232_v62 }
 0x241   :  { %v234_v6 = vadd.f32 %v465_v57, %v233_v2 }
 0x242   :  { %v467_v9 = vpop.eup %466 }
 0x243   :  { %v348_v11 = vmul.f32 %v467_v9, %v736_v59  ;;  %v238_v12 = vsel %vm237_vm5, %v465_v57, %v234_v6  ;;  %vm353_vm7 = vweird.f32 %v467_v9  ;;  %v188_v43 = vpop.f32.mrf.mxu1 }
 0x244   :  { %v243_v15 = vsel %vm240_vm6, %v242_v10, %v238_v12  ;;  %vm354_vm9 = vmor %vm352_vm8, %vm353_vm7  ;;  %v385_v44 = vadd.f32 %v459_v39, %v188_v43 }
 0x245   :  { %v349_v16 = vsub.f32 1.0, %v348_v11  ;;  %v244_v19 = vmul.f32 %v728_v37, %v243_v15 }
 0x247   :  { %v350_v23 = vmul.f32 %v467_v9, %v349_v16  ;;  %447 = vmatmul.msk.f32.vlgmr.msrb.gmra.mxu3 %vm220_vm1, %v244_v19 }
 0x249   :  { %v351_v27 = vadd.f32 %v467_v9, %v350_v23 }
 0x24b   :  { %v355_v30 = vsel %vm354_vm9, %v467_v9, %v351_v27 }
 0x24c   :  { %v360_v31 = vsel %vm357_vm10, %v359_v29, %v355_v30 }
 0x24d   :  { %v361_v32 = vmul.f32 %v732_v40, %v360_v31  ;;  %v271_v40 = vadd.f32 %v459_v39, %v185_v38 }
 0x24f   :  { %449 = vmatmul.msk.f32.vlgmr.msrb.gmra.mxu2 %vm220_vm1, %v361_v32 }
 0x2ca   :  { %v265_v36 = vpop.f32.mrf.mxu3 }
 0x2cb   :  { %304 = vmatmul.f32.vlgmr.msra.gmra.mxu3 %v265_v36 }
 0x2d2   :  { %v382_v37 = vpop.f32.mrf.mxu2 }
 0x2d3   :  { %418 = vmatmul.f32.vlgmr.msra.gmra.mxu2 %v382_v37 }
 0x34e   :  { %v305_v41 = vpop.f32.mrf.mxu3 }
 0x34f   :  { %v308_v42 = vadd.f32 %v305_v41, %v271_v40 }
 0x351   :  { %468 = vtanh.f32 %v308_v42 }
 0x356   :  { %v419_v45 = vpop.f32.mrf.mxu2 }
 0x357   :  { %v469_v46 = vpop.eup %468  ;;  %v422_v17 = vadd.f32 %v419_v45, %v385_v44 }
 0x358   :  { %310 = vst [vmem:[#allocation13] sm:$0xff] %v469_v46 }
 0x359   :  { %470 = vtanh.f32 %v422_v17 }
 0x35f   :  { %v471_v18 = vpop.eup %470 }
 0x360   :  { %425 = vst [vmem:[#allocation13 + $0x8] sm:$0xff] %v471_v18 }
 0x361   :  { %438 = dma.vmem_to_hbm [thread:$0]  %s431_s8, 256, %s433_s0, [#allocation6], %s640_s12, %s640_s12, %s641_s13  }
 0x362   :  { %636 = dma.done.wait [#allocation6], 256  }
 0x363   :  { %637 = vsyncadd [#allocation6], 4294967040 }
 0x364   :  { %443 = vsyncpa [#allocation5], 1 }
 0x365   :  { %444 = vsyncpa [#allocation8], 1 }
 0x366   :  { %445 = vsyncpa [#allocation11], 1 }
 0x367   :  { %446 = vsyncpa [#allocation6], 1 }

</bundles_post_ra>
